<compile_context>
chip_gen: v7x
topology: tpu7x:2x2x1
jax: 0.10.0
libtpu: 0.0.40
codegen_flags: <defaults>
</compile_context>

<pallas_src>
import math

import jax
import jax.numpy as jnp
from jax import lax
from jax.experimental import pallas as pl
from jax.experimental.pallas import tpu as pltpu

_INV_SQRT2 = 1.0 / math.sqrt(2.0)


def _round_up(x, m):
    return ((x + m - 1) // m) * m


def _cdiv(a, b):
    return -(-a // b)


def _tpu_hw_info():
    """(generation tag in {'v5','v6','v7',None}, VMEM capacity bytes)."""
    kind = ""
    try:
        kind = jax.devices()[0].device_kind.lower()
    except Exception:
        pass
    gen = None
    for g in ("v7", "v6", "v5"):
        if g in kind:
            gen = g
            break
    vmem = None
    try:
        vmem = int(pltpu.get_tpu_info().vmem_capacity_bytes)
    except Exception:
        vmem = None
    if vmem is None or vmem <= 0:
        vmem = (64 << 20) if gen == "v7" else (128 << 20) if gen in ("v5", "v6") else (64 << 20)
    return gen, vmem


def _make_falcon_mlp_kernel(tf, rem):
    """Kernel body; `rem` is the (static) number of valid ffn columns in the
    last F chunk (== tf when F divides evenly)."""
    ragged = rem != tf

    def kernel(x_ref, w1_ref, w2_ref, o_ref, acc_ref):
        # x_ref : (tm, H)   activation row tile (compute dtype), same block for every f
        # w1_ref: (H, tf)   dense_h_to_4h column tile
        # w2_ref: (tf, H)   dense_4h_to_h row tile
        # o_ref : (tm, H)   output tile (written once, at the last f step)
        # acc_ref: (tm, H)  f32 VMEM accumulator, resident across the F axis
        f = pl.program_id(1)
        nf = pl.num_programs(1)

        @pl.when(f == 0)
        def _():
            acc_ref[...] = jnp.zeros_like(acc_ref)

        def accumulate(n_cols):
            # hidden -> ffn chunk (MXU, f32 accumulation)
            h = jnp.dot(x_ref[...], w1_ref[:, :n_cols],
                        preferred_element_type=jnp.float32)
            # Exact erf-GELU in f32 (torch.nn.GELU(approximate='none')).
            h = 0.5 * h * (1.0 + lax.erf(h * _INV_SQRT2))
            # ffn chunk -> hidden, accumulate into the resident f32 scratch.
            acc_ref[...] += jnp.dot(h.astype(w2_ref.dtype), w2_ref[:n_cols, :],
                                    preferred_element_type=jnp.float32)

        if ragged:
            # The last W1/W2 blocks extend past F; only read the valid
            # static prefix (never touch the undefined tail of the buffer).
            @pl.when(f < nf - 1)
            def _():
                accumulate(tf)

            @pl.when(f == nf - 1)
            def _():
                accumulate(rem)
        else:
            accumulate(tf)

        @pl.when(f == nf - 1)
        def _():
            o_ref[...] = acc_ref[...].astype(o_ref.dtype)

    return kernel


def _pick_tiles(M, H, F, cd_size, out_size, tm_target=None):
    """Choose (tm, tf, vmem_bytes, generation) sized for this TPU generation."""
    gen, vmem = _tpu_hw_info()
    if tm_target is None:
        # Roofline crossover (FLOPs/weight-byte ~= tm): v5e ~240, v6e ~640,
        # v7x ~310 -> keep 256 on v5e, go big on v6e, medium on v7x.
        tm_target = {"v5": 256, "v6": 1024, "v7": 512}.get(
            gen, 512 if vmem > (96 << 20) else 384)

    F128 = _round_up(F, 128)
    reserve = max(12 << 20, vmem // 10)       # compiler / Mosaic scratch headroom
    budget = vmem - reserve

    tm = min(_round_up(M, 8), _round_up(int(tm_target), 8))
    # Balance row tiles so M padding stays small.
    steps_m = _cdiv(M, tm)
    tm = min(tm, _round_up(_cdiv(M, steps_m), 8))
    # v7x has two TensorCores: give the parallel M axis >= 2 steps for
    # prefill-sized M so the second core is not idle.
    if gen == "v7" and M >= 256 and _cdiv(M, tm) == 1:
        tm = _round_up(_cdiv(M, 2), 8)

    # Keep W1 strided-DMA runs >= ~1 KB (tf*2 bytes); relax slightly on v7x
    # where VMEM is only 64 MiB.
    tf_floor = min(384 if gen == "v7" else 512, F128)

    def tf_for(tm_):
        # Fixed residents: x + out double buffers, f32 accumulator, f32
        # second-matmul temp.
        fixed = tm_ * H * (2 * cd_size + 2 * out_size + 4 + 4)
        # Per ffn-column: double-buffered W1 col tile + W2 row tile, f32 h
        # chunk, compute-dtype h copy, ~one GELU temp.
        per_col = 4 * H * cd_size + tm_ * (4 + cd_size + 4)
        avail = budget - fixed
        if avail <= 0:
            return 0
        return min((avail // per_col) // 128 * 128, F128)

    tf = tf_for(tm)
    while tf < tf_floor and tm > 256:
        tm = max(256, tm - 128)
        tf = tf_for(tm)
    while tf < 128 and tm > 8:
        tm = max(8, _round_up(tm // 2, 8))
        tf = tf_for(tm)
    tf = max(tf, 128)

    # Balance F chunks: same number of grid steps, minimal ragged tail.
    steps_f = _cdiv(F128, tf)
    tf = min(tf, _round_up(_cdiv(F128, steps_f), 128))
    return tm, tf, vmem, gen


def falcon_mlp(x, w1, w2, *, tm=None, tf=None, compute_dtype=jnp.bfloat16,
               out_dtype=None, vmem_limit_bytes=None):
    """Fused Falcon MLP: GELU(x @ W1) @ W2 (no biases).

    x : [..., hidden]        e.g. [batch, 1, seq, hidden]
    w1: [hidden, 4*hidden]   dense_h_to_4h weight, stored [in, out]
    w2: [4*hidden, hidden]   dense_4h_to_h weight, stored [in, out]

    Pass bf16 weights to avoid any per-call weight copy.
    """
    orig_shape = x.shape
    H = orig_shape[-1]
    F = w1.shape[1]
    assert w1.shape == (H, F) and w2.shape == (F, H), (w1.shape, w2.shape)
    out_dtype = out_dtype or x.dtype

    x2d = x.reshape(-1, H)
    M = x2d.shape[0]

    cd_size = jnp.dtype(compute_dtype).itemsize
    out_size = jnp.dtype(out_dtype).itemsize

    tm_eff, tf_auto, vmem_bytes, _gen = _pick_tiles(
        M, H, F, cd_size, out_size, tm_target=tm)
    if tf is None:
        tf_eff = tf_auto
    else:
        tf_eff = max(128, min(_round_up(int(tf), 128), _round_up(F, 128)))
    if vmem_limit_bytes is None:
        vmem_limit_bytes = max(32 << 20, vmem_bytes - (4 << 20))

    # Cast only if needed (no-op / no copy when weights are already in
    # compute_dtype).  Activations are small relative to the weights.
    xc = x2d.astype(compute_dtype)
    w1c = w1 if w1.dtype == compute_dtype else w1.astype(compute_dtype)
    w2c = w2 if w2.dtype == compute_dtype else w2.astype(compute_dtype)

    # The kernel handles the ragged final F chunk with static prefix slices,
    # which requires F to be a multiple of 128 (true for Falcon's 18176).
    # Only in the rare misaligned case do we pad F (<=127 columns).
    F_eff = F
    if F % 128 != 0:
        F_eff = _round_up(F, 128)
        w1c = jnp.pad(w1c, ((0, 0), (0, F_eff - F)))
        w2c = jnp.pad(w2c, ((0, F_eff - F), (0, 0)))
    tf_eff = min(tf_eff, F_eff)

    # Pad only the (small) activation rows to a tile multiple.
    M_pad = _round_up(M, tm_eff)
    if M_pad != M:
        xc = jnp.pad(xc, ((0, M_pad - M), (0, 0)))

    grid_m = M_pad // tm_eff
    grid_f = _cdiv(F_eff, tf_eff)
    rem = F_eff - (grid_f - 1) * tf_eff      # static ragged tail (== tf_eff if even)

    kernel = _make_falcon_mlp_kernel(tf_eff, rem)

    cost = pl.CostEstimate(
        flops=4 * M_pad * H * F_eff,                       # two matmuls
        transcendentals=M_pad * F_eff,                     # erf per ffn element
        bytes_accessed=(M_pad * H * (cd_size + out_size)
                        + grid_m * 2 * H * F_eff * cd_size),
    )

    out2d = pl.pallas_call(
        kernel,
        out_shape=jax.ShapeDtypeStruct((M_pad, H), out_dtype),
        grid_spec=pltpu.PrefetchScalarGridSpec(
            num_scalar_prefetch=0,
            grid=(grid_m, grid_f),
            in_specs=[
                pl.BlockSpec((tm_eff, H), lambda i, f: (i, 0)),   # activations
                pl.BlockSpec((H, tf_eff), lambda i, f: (0, f)),   # W1 col tile
                pl.BlockSpec((tf_eff, H), lambda i, f: (f, 0)),   # W2 row tile
            ],
            out_specs=pl.BlockSpec((tm_eff, H), lambda i, f: (i, 0)),
            scratch_shapes=[pltpu.VMEM((tm_eff, H), jnp.float32)],
        ),
        compiler_params=pltpu.CompilerParams(
            dimension_semantics=("parallel", "arbitrary"),
            vmem_limit_bytes=int(vmem_limit_bytes),
        ),
        cost_estimate=cost,
    )(xc, w1c, w2c)

    if M_pad != M:
        out2d = out2d[:M]
    return out2d.reshape(orig_shape)


def falcon_mlp_ref(x, w1, w2, compute_dtype=jnp.bfloat16):
    """Pure-JAX reference matching HF FalconMLP semantics (same casts as the
    kernel, f32 accumulation)."""
    xc = x.astype(compute_dtype)
    w1c = w1.astype(compute_dtype)
    w2c = w2.astype(compute_dtype)
    h = jnp.dot(xc, w1c, preferred_element_type=jnp.float32)
    h = 0.5 * h * (1.0 + lax.erf(h * _INV_SQRT2))
    y = jnp.dot(h.astype(compute_dtype), w2c, preferred_element_type=jnp.float32)
    return y.astype(x.dtype)


if __name__ == "__main__":
    key = jax.random.PRNGKey(0)

    # --- Test 1: Falcon-style input [batch, 1, seq, hidden], auto tiles.
    # seq=9 makes batch*seq not a tile multiple to exercise row padding.
    batch, seq, hidden = 2, 9, 128
    ffn = 4 * hidden  # 512
    kx, k1, k2, kx2, k3, k4 = jax.random.split(key, 6)

    x = jax.random.normal(kx, (batch, 1, seq, hidden), dtype=jnp.float32)
    # Synthetic weights with FalconMLP shapes, stored [in, out]
    # (transpose of nn.Linear's [out, in]).
    w1 = jax.random.normal(k1, (hidden, ffn), dtype=jnp.float32) * 0.02
    w2 = jax.random.normal(k2, (ffn, hidden), dtype=jnp.float32) * 0.02

    out = jax.block_until_ready(falcon_mlp(x, w1, w2))
    ref = falcon_mlp_ref(x, w1, w2)
    assert out.shape == x.shape, (out.shape, x.shape)
    assert jnp.allclose(out, ref, atol=1e-2, rtol=1e-2), float(
        jnp.max(jnp.abs(out - ref)))

    # --- Test 2: force a ragged F tail (F=1024 split as 384+384+256) to
    # exercise the in-kernel static-prefix masking path.
    hidden2, ffn2 = 256, 1024
    x2 = jax.random.normal(kx2, (1, 1, 20, hidden2), dtype=jnp.float32)
    w1b = (jax.random.normal(k3, (hidden2, ffn2), dtype=jnp.float32) * 0.02
           ).astype(jnp.bfloat16)   # bf16 weights => no per-call weight copy
    w2b = (jax.random.normal(k4, (ffn2, hidden2), dtype=jnp.float32) * 0.02
           ).astype(jnp.bfloat16)

    out2 = jax.block_until_ready(falcon_mlp(x2, w1b, w2b, tf=384))
    ref2 = falcon_mlp_ref(x2, w1b, w2b)
    assert out2.shape == x2.shape, (out2.shape, x2.shape)
    assert jnp.allclose(out2, ref2, atol=1e-2, rtol=1e-2), float(
        jnp.max(jnp.abs(out2 - ref2)))

    print("KERNEL_OK")
</pallas_src>

<mosaic_0001>
module attributes {stable_mosaic.version = 11 : i64} {
  func.func @kernel(%arg0: i32, %arg1: i32, %arg2: memref<24x128xbf16, #tpu.memory_space<vmem>>, %arg3: memref<128x512xbf16, #tpu.memory_space<vmem>>, %arg4: memref<512x128xbf16, #tpu.memory_space<vmem>>, %arg5: memref<24x128xf32, #tpu.memory_space<vmem>>, %arg6: memref<24x128xf32, #tpu.memory_space<vmem>>) attributes {dimension_semantics = [#tpu.dimension_semantics<parallel>, #tpu.dimension_semantics<arbitrary>], iteration_bounds = array<i64: 1, 1>, scalar_prefetch = 0 : i64, scratch_operands = 1 : i64, tpu.core_type = #tpu.core_type<tc>, window_params = [{transform_indices = @transform_0, window_bounds = array<i64: 24, 128>}, {transform_indices = @transform_1, window_bounds = array<i64: 128, 512>}, {transform_indices = @transform_2, window_bounds = array<i64: 512, 128>}, {transform_indices = @transform_3, window_bounds = array<i64: 24, 128>}]} {
    %c0_i32 = arith.constant 0 : i32
    %0 = arith.cmpi eq, %arg1, %c0_i32 : i32
    %1 = arith.extui %0 : i1 to i32
    %c0_i32_0 = arith.constant 0 : i32
    %2 = arith.cmpi ne, %1, %c0_i32_0 : i32
    scf.if %2 {
      %cst_16 = arith.constant 0.000000e+00 : f32
      %23 = vector.broadcast %cst_16 : f32 to vector<24x128xf32>
      %c0_17 = arith.constant 0 : index
      %c0_18 = arith.constant 0 : index
      %24 = vector.load %arg6[%c0_17, %c0_18] : memref<24x128xf32, #tpu.memory_space<vmem>>, vector<24x128xf32>
      tpu.vector_store %arg6[%c0_17, %c0_18], %23 {strides = array<i32>} : memref<24x128xf32, #tpu.memory_space<vmem>>, vector<24x128xf32>,
    } else {
    }
    %c0 = arith.constant 0 : index
    %c0_1 = arith.constant 0 : index
    %3 = vector.load %arg2[%c0, %c0_1] : memref<24x128xbf16, #tpu.memory_space<vmem>>, vector<24x128xbf16>
    %c0_2 = arith.constant 0 : index
    %c0_3 = arith.constant 0 : index
    %4 = vector.load %arg3[%c0_2, %c0_3] : memref<128x512xbf16, #tpu.memory_space<vmem>>, vector<128x512xbf16>
    %cst = arith.constant dense<0.000000e+00> : vector<24x512xf32>
    %5 = tpu.matmul %3, %4, %cst {dimension_numbers = #tpu.dot_dimension_numbers<[1], [0], [0], [1], [0, 0, 1, 1], [], []>} : vector<24x128xbf16>, vector<128x512xbf16>, vector<24x512xf32> -> vector<24x512xf32>
    %cst_4 = arith.constant 5.000000e-01 : f32
    %6 = vector.broadcast %cst_4 : f32 to vector<24x512xf32>
    %7 = arith.mulf %6, %5 : vector<24x512xf32>
    %cst_5 = arith.constant 0.707106769 : f32
    %8 = vector.broadcast %cst_5 : f32 to vector<24x512xf32>
    %9 = arith.mulf %5, %8 : vector<24x512xf32>
    %10 = math.erf %9 : vector<24x512xf32>
    %cst_6 = arith.constant 1.000000e+00 : f32
    %11 = vector.broadcast %cst_6 : f32 to vector<24x512xf32>
    %12 = arith.addf %11, %10 : vector<24x512xf32>
    %13 = arith.mulf %7, %12 : vector<24x512xf32>
    %c0_7 = arith.constant 0 : index
    %c0_8 = arith.constant 0 : index
    %14 = vector.load %arg6[%c0_7, %c0_8] : memref<24x128xf32, #tpu.memory_space<vmem>>, vector<24x128xf32>
    %15 = arith.truncf %13 : vector<24x512xf32> to vector<24x512xbf16>
    %c0_9 = arith.constant 0 : index
    %c0_10 = arith.constant 0 : index
    %16 = vector.load %arg4[%c0_9, %c0_10] : memref<512x128xbf16, #tpu.memory_space<vmem>>, vector<512x128xbf16>
    %cst_11 = arith.constant dense<0.000000e+00> : vector<24x128xf32>
    %17 = tpu.matmul %15, %16, %cst_11 {dimension_numbers = #tpu.dot_dimension_numbers<[1], [0], [0], [1], [0, 0, 1, 1], [], []>} : vector<24x512xbf16>, vector<512x128xbf16>, vector<24x128xf32> -> vector<24x128xf32>
    %18 = arith.addf %14, %17 : vector<24x128xf32>
    %c0_12 = arith.constant 0 : index
    %c0_13 = arith.constant 0 : index
    %19 = vector.load %arg6[%c0_12, %c0_13] : memref<24x128xf32, #tpu.memory_space<vmem>>, vector<24x128xf32>
    tpu.vector_store %arg6[%c0_12, %c0_13], %18 {strides = array<i32>} : memref<24x128xf32, #tpu.memory_space<vmem>>, vector<24x128xf32>,
    %c0_i32_14 = arith.constant 0 : i32
    %20 = arith.cmpi eq, %arg1, %c0_i32_14 : i32
    %21 = arith.extui %20 : i1 to i32
    %c0_i32_15 = arith.constant 0 : i32
    %22 = arith.cmpi ne, %21, %c0_i32_15 : i32
    scf.if %22 {
      %c0_16 = arith.constant 0 : index
      %c0_17 = arith.constant 0 : index
      %23 = vector.load %arg6[%c0_16, %c0_17] : memref<24x128xf32, #tpu.memory_space<vmem>>, vector<24x128xf32>
      %c0_18 = arith.constant 0 : index
      %c0_19 = arith.constant 0 : index
      %24 = vector.load %arg5[%c0_18, %c0_19] : memref<24x128xf32, #tpu.memory_space<vmem>>, vector<24x128xf32>
      tpu.vector_store %arg5[%c0_18, %c0_19], %23 {strides = array<i32>} : memref<24x128xf32, #tpu.memory_space<vmem>>, vector<24x128xf32>,
    } else {
    }
    return
  }
  func.func @transform_0(%arg0: i32, %arg1: i32) -> (i32, i32) {
    %c0_i32 = arith.constant 0 : i32
    %c0_i32_0 = arith.constant 0 : i32
    return %arg0, %c0_i32 : i32, i32
  }
  func.func @transform_1(%arg0: i32, %arg1: i32) -> (i32, i32) {
    %c0_i32 = arith.constant 0 : i32
    %c0_i32_0 = arith.constant 0 : i32
    return %c0_i32, %arg1 : i32, i32
  }
  func.func @transform_2(%arg0: i32, %arg1: i32) -> (i32, i32) {
    %c0_i32 = arith.constant 0 : i32
    %c0_i32_0 = arith.constant 0 : i32
    return %arg1, %c0_i32 : i32, i32
  }
  func.func @transform_3(%arg0: i32, %arg1: i32) -> (i32, i32) {
    %c0_i32 = arith.constant 0 : i32
    %c0_i32_0 = arith.constant 0 : i32
    return %arg0, %c0_i32 : i32, i32
  }
}

</mosaic_0001>

<bundles_post_ra>
// kernel: tpu_custom_call.1
= control target key start
LH: loop header
LB: loop body
LE: loop exit
PB: predicated region body
PF: predicated region fallthrough
CT: control target
= control target key end

     0   :  { %8 = vsyncpa [#allocation4], 0  ;;  %s1251_s0 = inlined_call_operand.hbm [shape: bf16[24,128], index: 0, kind: input, shape index: {}]   ;;  %s1252_s1 = inlined_call_operand.hbm [shape: bf16[128,512], index: 1, kind: input, shape index: {}]   ;;  %s1253_s2 = inlined_call_operand.hbm [shape: bf16[512,128], index: 2, kind: input, shape index: {}]   ;;  %s1254_s3 = inlined_call_operand.hbm [shape: f32[24,128], index: 3, kind: output, shape index: {}]  }
   0x1   :  { %9 = vsyncpa [#allocation7], 0 }
   0x2   :  { %10 = vsyncpa [#allocation5], 0  ;;  %s1160_s12 = smov [#allocation6]   ;;  %s1066_s16 = scalar_lea.hbm %s1252_s1, 4096 }
   0x3   :  { %s28_s13 = sshll.u32 %s1160_s12, 4  ;;  %p1067_p0 = scmp.ne.s32.totalorder %s1252_s1, %s1066_s16  ;;  %s29_s13 = int_to_ptr.vmem [resolvable:$true] %s28_s13 }
   0x4   :  { %p1070_p1 = scmp.lt.u32.totalorder %s1066_s16, %s1252_s1 }
   0x6   :  { %p1072_p2 = pnand %p1070_p1, %p1067_p0 }
   0x8   :  { %1075 = shalt.err (!%p1072_p2)
}
   0x9   :  { %s1076_s21 = scalar_lea.vmem %s29_s13, 4096  ;;  %p1081_p4 = scmp.lt.s32.totalorder %s29_s13, %s29_s13 }
   0xa   :  { %p1077_p3 = scmp.ne.s32.totalorder %s29_s13, %s1076_s21  ;;  %p1082_p5 = scmp.lt.s32.totalorder %s1076_s21, %s1076_s21 }
   0xc   :  { %p1083_p6 = por %p1082_p5, %p1081_p4 }
   0xe   :  { %p1084_p7 = pnand %p1083_p6, %p1077_p3 }
  0x10   :  { %1087 = shalt.err (!%p1084_p7)
}
  0x11   :  { %s1161_s22 = smov 256   ;;  %s1162_s23 = smov 16  }
  0x12   :  { %34 = dma.hbm_to_vmem [thread:$0]  %s1252_s1, 4096, %s29_s13, [#allocation7], %s1161_s22, %s1161_s22, %s1162_s23  }
  0x13   :  { %s1163_s26 = smov [#allocation3]   ;;  %s1088_s30 = scalar_lea.hbm %s1251_s0, 192 }
  0x14   :  { %s16_s27 = sshll.u32 %s1163_s26, 4  ;;  %p1089_p8 = scmp.ne.s32.totalorder %s1251_s0, %s1088_s30  ;;  %s17_s27 = int_to_ptr.vmem [resolvable:$true] %s16_s27 }
  0x15   :  { %p1092_p9 = scmp.lt.u32.totalorder %s1088_s30, %s1251_s0 }
  0x17   :  { %p1094_p10 = pnand %p1092_p9, %p1089_p8 }
  0x19   :  { %1097 = shalt.err (!%p1094_p10)
}
  0x1a   :  { %s1098_s8 = scalar_lea.vmem %s17_s27, 192  ;;  %p1103_p12 = scmp.lt.s32.totalorder %s17_s27, %s17_s27 }
  0x1b   :  { %p1099_p11 = scmp.ne.s32.totalorder %s17_s27, %s1098_s8  ;;  %p1104_p13 = scmp.lt.s32.totalorder %s1098_s8, %s1098_s8 }
  0x1d   :  { %p1105_p0 = por %p1104_p13, %p1103_p12 }
  0x1f   :  { %p1106_p1 = pnand %p1105_p0, %p1099_p11 }
  0x21   :  { %1109 = shalt.err (!%p1106_p1)
}
  0x22   :  { %s1164_s1 = smov 64   ;;  %s1165_s9 = smov 4  }
  0x23   :  { %22 = dma.hbm_to_vmem [thread:$0]  %s1251_s0, 192, %s17_s27, [#allocation4], %s1164_s1, %s1164_s1, %s1165_s9  }
  0x24   :  { %s1166_s12 = smov [#allocation8]   ;;  %s1110_s16 = scalar_lea.hbm %s1253_s2, 4096 }
  0x25   :  { %s40_s13 = sshll.u32 %s1166_s12, 4  ;;  %p1111_p2 = scmp.ne.s32.totalorder %s1253_s2, %s1110_s16  ;;  %s41_s13 = int_to_ptr.vmem [resolvable:$true] %s40_s13 }
  0x26   :  { %p1114_p3 = scmp.lt.u32.totalorder %s1110_s16, %s1253_s2 }
  0x28   :  { %p1116_p4 = pnand %p1114_p3, %p1111_p2 }
  0x2a   :  { %1119 = shalt.err (!%p1116_p4)
}
  0x2b   :  { %s1120_s21 = scalar_lea.vmem %s41_s13, 4096  ;;  %p1125_p6 = scmp.lt.s32.totalorder %s41_s13, %s41_s13 }
  0x2c   :  { %p1121_p5 = scmp.ne.s32.totalorder %s41_s13, %s1120_s21  ;;  %p1126_p7 = scmp.lt.s32.totalorder %s1120_s21, %s1120_s21 }
  0x2e   :  { %p1127_p8 = por %p1126_p7, %p1125_p6 }
  0x30   :  { %p1128_p9 = pnand %p1127_p8, %p1121_p5 }
  0x32   :  { %1131 = shalt.err (!%p1128_p9)
}
  0x33   :  { %46 = dma.hbm_to_vmem [thread:$0]  %s1253_s2, 4096, %s41_s13, [#allocation7], %s1164_s1, %s1164_s1, %s1165_s9  }
  0x34   :  { %1154 = dma.done.wait [#allocation4], 192  }
  0x35   :  { %1155 = vsyncadd [#allocation4], 4294967104 }
  0x36   :  { %1156 = dma.done.wait [#allocation7], 8192  }
  0x37   :  { %1157 = vsyncadd [#allocation7], 4294959104  ;;  %v1167_v0 = vmov 0   ;;  %v960_v1 = vld [vmem:[#allocation6 + $0x4] ss:$16 sps:$4 sm:$0xff]   ;;  %v1014_v38 = vld [vmem:[#allocation8 + $0x48] sm:$0xff]  }
  0x38   :  { %301 = vmatprep.mubr.bf16.mxu0 %v1167_v0  ;;  %352 = vmatprep.mubr.bf16.mxu1 %v1167_v0  ;;  %v962_v2 = vld [vmem:[#allocation6 + $0xc] ss:$16 sps:$4 sm:$0xff]   ;;  %v964_v3 = vld [vmem:[#allocation6] ss:$16 sps:$4 sm:$0xff]   ;;  %v965_v4 = vld [vmem:[#allocation6 + $0x8] ss:$16 sps:$4 sm:$0xff]  }
  0x39   :  { %269 = vmatprep.subr.bf16.mxu0 %v960_v1  ;;  %320 = vmatprep.subr.bf16.mxu1 %v962_v2  ;;  %v966_v5 = vld [vmem:[#allocation6 + $0x24] ss:$16 sps:$4 sm:$0xff]   ;;  %v968_v6 = vld [vmem:[#allocation6 + $0x2c] ss:$16 sps:$4 sm:$0xff]   ;;  %v970_v7 = vld [vmem:[#allocation6 + $0x20] ss:$16 sps:$4 sm:$0xff]  }
  0x3a   :  { %270 = vmatpush1.bf16.msra.mxu0 %v964_v3  ;;  %321 = vmatpush1.bf16.msra.mxu1 %v965_v4  ;;  %v971_v8 = vld [vmem:[#allocation6 + $0x28] ss:$16 sps:$4 sm:$0xff]   ;;  %v972_v9 = vld [vmem:[#allocation6 + $0x44] ss:$16 sps:$4 sm:$0xff]   ;;  %v974_v10 = vld [vmem:[#allocation6 + $0x4c] ss:$16 sps:$4 sm:$0xff]  }
  0x3b   :  { %271 = vmatprep.subr.bf16.mxu0 %v966_v5  ;;  %322 = vmatprep.subr.bf16.mxu1 %v968_v6  ;;  %v976_v11 = vld [vmem:[#allocation6 + $0x40] ss:$16 sps:$4 sm:$0xff]   ;;  %v977_v12 = vld [vmem:[#allocation6 + $0x48] ss:$16 sps:$4 sm:$0xff]   ;;  %v978_v13 = vld [vmem:[#allocation6 + $0x64] ss:$16 sps:$4 sm:$0xff]  }
  0x3c   :  { %v980_v14 = vld [vmem:[#allocation6 + $0x6c] ss:$16 sps:$4 sm:$0xff]   ;;  %v982_v15 = vld [vmem:[#allocation6 + $0x60] ss:$16 sps:$4 sm:$0xff]   ;;  %v983_v16 = vld [vmem:[#allocation6 + $0x68] ss:$16 sps:$4 sm:$0xff]  }
  0x3d   :  { %v984_v17 = vld [vmem:[#allocation6 + $0x84] ss:$16 sps:$4 sm:$0xff]   ;;  %v986_v18 = vld [vmem:[#allocation6 + $0x8c] ss:$16 sps:$4 sm:$0xff]   ;;  %v988_v19 = vld [vmem:[#allocation6 + $0x80] ss:$16 sps:$4 sm:$0xff]  }
  0x3e   :  { %272 = vmatpush1.bf16.msra.mxu0 %v970_v7  ;;  %323 = vmatpush1.bf16.msra.mxu1 %v971_v8  ;;  %v989_v20 = vld [vmem:[#allocation6 + $0x88] ss:$16 sps:$4 sm:$0xff]   ;;  %v990_v21 = vld [vmem:[#allocation6 + $0xa4] ss:$16 sps:$4 sm:$0xff]   ;;  %v992_v22 = vld [vmem:[#allocation6 + $0xac] ss:$16 sps:$4 sm:$0xff]  }
  0x3f   :  { %273 = vmatprep.subr.bf16.mxu0 %v972_v9  ;;  %324 = vmatprep.subr.bf16.mxu1 %v974_v10  ;;  %v994_v23 = vld [vmem:[#allocation6 + $0xa0] ss:$16 sps:$4 sm:$0xff]   ;;  %v995_v24 = vld [vmem:[#allocation6 + $0xa8] ss:$16 sps:$4 sm:$0xff]   ;;  %v996_v25 = vld [vmem:[#allocation6 + $0xc4] ss:$16 sps:$4 sm:$0xff]  }
  0x40   :  { %v998_v26 = vld [vmem:[#allocation6 + $0xcc] ss:$16 sps:$4 sm:$0xff]   ;;  %v1000_v27 = vld [vmem:[#allocation6 + $0xc0] ss:$16 sps:$4 sm:$0xff]   ;;  %v1001_v28 = vld [vmem:[#allocation6 + $0xc8] ss:$16 sps:$4 sm:$0xff]  }
  0x41   :  { %v1002_v29 = vld [vmem:[#allocation6 + $0xe4] ss:$16 sps:$4 sm:$0xff]   ;;  %v1004_v30 = vld [vmem:[#allocation6 + $0xec] ss:$16 sps:$4 sm:$0xff]   ;;  %v1006_v31 = vld [vmem:[#allocation6 + $0xe0] ss:$16 sps:$4 sm:$0xff]  }
  0x42   :  { %274 = vmatpush1.bf16.msra.mxu0 %v976_v11  ;;  %325 = vmatpush1.bf16.msra.mxu1 %v977_v12  ;;  %v1007_v32 = vld [vmem:[#allocation6 + $0xe8] ss:$16 sps:$4 sm:$0xff]   ;;  %v1010_v33 = vld [vmem:[#allocation8 + $0x40] sm:$0xff]   ;;  %v1009_v42 = vld [vmem:[#allocation3 + $0x8] ss:$0 sps:$4 sm:$0xff]   ;;  %s1168_s2 = smov [#allocation9]  }
  0x43   :  { %275 = vmatprep.subr.bf16.mxu0 %v978_v13  ;;  %326 = vmatprep.subr.bf16.mxu1 %v980_v14  ;;  %v1011_v34 = vld [vmem:[#allocation8 + $0xc0] sm:$0xff]   ;;  %v1008_v35 = vld [vmem:[#allocation3] sm:$0xff]   ;;  %v1015_v39 = vld [vmem:[#allocation8 + $0xc8] sm:$0xff]   ;;  %s814_s23 = sshll.u32 %s1168_s2, 4  ;;  %s815_s23 = int_to_ptr.vmem [resolvable:$true] %s814_s23 }
  0x44   :  { %v1012_v36 = vld [vmem:[#allocation8] sm:$0xff]   ;;  %v1016_v40 = vld [vmem:[#allocation8 + $0x8] sm:$0xff]   ;;  %v1018_v43 = vld [vmem:[#allocation8 + $0x50] sm:$0xff]   ;;  %s1132_s24 = scalar_lea.vmem %s815_s23, 384  ;;  %p1137_p11 = scmp.lt.s32.totalorder %s815_s23, %s815_s23 }
  0x45   :  { %v1013_v37 = vld [vmem:[#allocation8 + $0x80] sm:$0xff]   ;;  %v1017_v41 = vld [vmem:[#allocation8 + $0x88] sm:$0xff]   ;;  %v1019_v44 = vld [vmem:[#allocation8 + $0xd0] sm:$0xff]   ;;  %p1133_p10 = scmp.ne.s32.totalorder %s815_s23, %s1132_s24  ;;  %p1138_p12 = scmp.lt.s32.totalorder %s1132_s24, %s1132_s24 }
  0x46   :  { %276 = vmatpush1.bf16.msra.mxu0 %v982_v15  ;;  %327 = vmatpush1.bf16.msra.mxu1 %v983_v16  ;;  %v1020_v45 = vld [vmem:[#allocation8 + $0x10] sm:$0xff]   ;;  %v1022_v47 = vld [vmem:[#allocation8 + $0x58] sm:$0xff]   ;;  %v1026_v51 = vld [vmem:[#allocation8 + $0x60] sm:$0xff]  }
  0x47   :  { %277 = vmatprep.subr.bf16.mxu0 %v984_v17  ;;  %328 = vmatprep.subr.bf16.mxu1 %v986_v18  ;;  %v1021_v46 = vld [vmem:[#allocation8 + $0x90] sm:$0xff]   ;;  %v1023_v48 = vld [vmem:[#allocation8 + $0xd8] sm:$0xff]   ;;  %v1027_v52 = vld [vmem:[#allocation8 + $0xe0] sm:$0xff]   ;;  %p1139_p13 = por %p1138_p12, %p1137_p11 }
  0x48   :  { %v1024_v49 = vld [vmem:[#allocation8 + $0x18] sm:$0xff]   ;;  %v1028_v53 = vld [vmem:[#allocation8 + $0x20] sm:$0xff]   ;;  %v1030_v55 = vld [vmem:[#allocation8 + $0x68] sm:$0xff]  }
  0x49   :  { %v1025_v50 = vld [vmem:[#allocation8 + $0x98] sm:$0xff]   ;;  %v1029_v54 = vld [vmem:[#allocation8 + $0xa0] sm:$0xff]   ;;  %v1031_v56 = vld [vmem:[#allocation8 + $0xe8] sm:$0xff]   ;;  %p1140_p0 = pnand %p1139_p13, %p1133_p10 }
  0x4a   :  { %278 = vmatpush1.bf16.msra.mxu0 %v988_v19  ;;  %329 = vmatpush1.bf16.msra.mxu1 %v989_v20  ;;  %v1032_v57 = vld [vmem:[#allocation8 + $0x28] sm:$0xff]   ;;  %v1034_v59 = vld [vmem:[#allocation8 + $0x70] sm:$0xff]   ;;  %v1038_v63 = vld [vmem:[#allocation8 + $0x78] sm:$0xff]  }
  0x4b   :  { %279 = vmatprep.subr.bf16.mxu0 %v990_v21  ;;  %330 = vmatprep.subr.bf16.mxu1 %v992_v22  ;;  %v1033_v58 = vld [vmem:[#allocation8 + $0xa8] sm:$0xff]   ;;  %v1035_v60 = vld [vmem:[#allocation8 + $0xf0] sm:$0xff]   ;;  %v1040_v1 = vld [vmem:[#allocation8 + $0x38] sm:$0xff]  }
  0x4c   :  { %v1036_v61 = vld [vmem:[#allocation8 + $0x30] sm:$0xff]   ;;  %v1041_v2 = vld [vmem:[#allocation8 + $0xb8] sm:$0xff]  }
  0x4d   :  { %v1037_v62 = vld [vmem:[#allocation8 + $0xb0] sm:$0xff]  }
  0x4e   :  { %280 = vmatpush1.bf16.msra.mxu0 %v994_v23  ;;  %331 = vmatpush1.bf16.msra.mxu1 %v995_v24 }
  0x4f   :  { %281 = vmatprep.subr.bf16.mxu0 %v996_v25  ;;  %332 = vmatprep.subr.bf16.mxu1 %v998_v26 }
  0x52   :  { %282 = vmatpush1.bf16.msra.mxu0 %v1000_v27  ;;  %333 = vmatpush1.bf16.msra.mxu1 %v1001_v28 }
  0x53   :  { %283 = vmatprep.subr.bf16.mxu0 %v1002_v29  ;;  %334 = vmatprep.subr.bf16.mxu1 %v1004_v30 }
  0x56   :  { %284 = vmatpush1.bf16.msra.mxu0 %v1006_v31  ;;  %335 = vmatpush1.bf16.msra.mxu1 %v1007_v32 }
  0x57   :  { %893 = vmatprep.subr.bf16.mxu0 %v1010_v33  ;;  %921 = vmatprep.subr.bf16.mxu1 %v1011_v34 }
  0x59   :  { %302 = vmatmul.mubr.bf16.vlgmr.msra.gmra.mrb[0].mxu0 %v1008_v35  ;;  %353 = vmatmul.mubr.bf16.vlgmr.msra.gmra.mrb[0].mxu1 %v1008_v35 }
  0x5a   :  { %311 = vmatprep.mubr.bf16.mxu0 %v1167_v0  ;;  %362 = vmatprep.mubr.bf16.mxu1 %v1167_v0  ;;  %v1039_v0 = vld [vmem:[#allocation8 + $0xf8] sm:$0xff]  }
  0x5b   :  { %894 = vmatpush3.bf16.msra.mxu0 %v1012_v36  ;;  %922 = vmatpush3.bf16.msra.mxu1 %v1013_v37 }
  0x5c   :  { %895 = vmatprep.subr.bf16.mxu0 %v1014_v38  ;;  %923 = vmatprep.subr.bf16.mxu1 %v1015_v39 }
  0x5f   :  { %896 = vmatpush3.bf16.msra.mxu0 %v1016_v40  ;;  %924 = vmatpush3.bf16.msra.mxu1 %v1017_v41 }
  0x60   :  { %897 = vmatprep.subr.bf16.mxu0 %v1018_v43  ;;  %925 = vmatprep.subr.bf16.mxu1 %v1019_v44 }
  0x61   :  { %312 = vmatmul.mubr.bf16.gmra.mrb[4].mxu0 %v1009_v42  ;;  %363 = vmatmul.mubr.bf16.gmra.mrb[4].mxu1 %v1009_v42 }
  0x63   :  { %898 = vmatpush3.bf16.msra.mxu0 %v1020_v45  ;;  %926 = vmatpush3.bf16.msra.mxu1 %v1021_v46 }
  0x64   :  { %899 = vmatprep.subr.bf16.mxu0 %v1022_v47  ;;  %927 = vmatprep.subr.bf16.mxu1 %v1023_v48 }
  0x67   :  { %900 = vmatpush3.bf16.msra.mxu0 %v1024_v49  ;;  %928 = vmatpush3.bf16.msra.mxu1 %v1025_v50 }
  0x68   :  { %901 = vmatprep.subr.bf16.mxu0 %v1026_v51  ;;  %929 = vmatprep.subr.bf16.mxu1 %v1027_v52 }
  0x6b   :  { %902 = vmatpush3.bf16.msra.mxu0 %v1028_v53  ;;  %930 = vmatpush3.bf16.msra.mxu1 %v1029_v54 }
  0x6c   :  { %903 = vmatprep.subr.bf16.mxu0 %v1030_v55  ;;  %931 = vmatprep.subr.bf16.mxu1 %v1031_v56 }
  0x6f   :  { %904 = vmatpush3.bf16.msra.mxu0 %v1032_v57  ;;  %932 = vmatpush3.bf16.msra.mxu1 %v1033_v58 }
  0x70   :  { %905 = vmatprep.subr.bf16.mxu0 %v1034_v59  ;;  %933 = vmatprep.subr.bf16.mxu1 %v1035_v60 }
  0x73   :  { %906 = vmatpush3.bf16.msra.mxu0 %v1036_v61  ;;  %934 = vmatpush3.bf16.msra.mxu1 %v1037_v62 }
  0x74   :  { %907 = vmatprep.subr.bf16.mxu0 %v1038_v63  ;;  %935 = vmatprep.subr.bf16.mxu1 %v1039_v0 }
  0x77   :  { %908 = vmatpush3.bf16.msra.mxu0 %v1040_v1  ;;  %936 = vmatpush3.bf16.msra.mxu1 %v1041_v2 }
 0x12c   :  { %v303_v3 = vpop.f32.mrb[0].mxu0  ;;  %v354_v4 = vpop.f32.mrb[0].mxu1 }
 0x12d   :  { %v383_v5 = vmul.f32 0.70710677, %v303_v3  ;;  %v385_v6 = vmul.f32 0.70710677, %v354_v4  ;;  %v305_v7 = vpop.f32.mrb[1].mxu0  ;;  %v356_v8 = vpop.f32.mrb[1].mxu1 }
 0x12e   :  { %v384_v9 = vmul.f32 0.70710677, %v305_v7  ;;  %v307_v10 = vpop.f32.mrb[2].mxu0  ;;  %v358_v11 = vpop.f32.mrb[2].mxu1  ;;  %v386_v12 = vmul.f32 0.70710677, %v356_v8 }
 0x12f   :  { %1042 = verf.f32 %v383_v5  ;;  %v387_v13 = vmul.f32 0.70710677, %v307_v10  ;;  %v309_v14 = vpop.f32.mrb[3].mxu0  ;;  %v389_v15 = vmul.f32 0.70710677, %v358_v11  ;;  %v360_v16 = vpop.f32.mrb[3].mxu1 }
 0x130   :  { %1044 = verf.f32 %v385_v6  ;;  %v388_v17 = vmul.f32 0.70710677, %v309_v14  ;;  %v390_v18 = vmul.f32 0.70710677, %v360_v16  ;;  %v371_v37 = vmul.f32 0.5, %v303_v3 }
 0x131   :  { %1046 = verf.f32 %v384_v9  ;;  %v373_v38 = vmul.f32 0.5, %v354_v4  ;;  %v372_v41 = vmul.f32 0.5, %v305_v7  ;;  %v375_v43 = vmul.f32 0.5, %v307_v10 }
 0x132   :  { %1048 = verf.f32 %v386_v12  ;;  %v374_v46 = vmul.f32 0.5, %v356_v8  ;;  %v377_v48 = vmul.f32 0.5, %v358_v11  ;;  %v376_v53 = vmul.f32 0.5, %v309_v14 }
 0x133   :  { %1050 = verf.f32 %v387_v13  ;;  %v378_v58 = vmul.f32 0.5, %v360_v16 }
 0x134   :  { %1052 = verf.f32 %v389_v15  ;;  %v1231_v19 = vpop.f32.mrb[4].mxu0  ;;  %v1233_v20 = vpop.f32.mrb[4].mxu1 }
 0x135   :  { %1054 = verf.f32 %v388_v17  ;;  %v391_v21 = vmul.f32 0.70710677, %v1231_v19  ;;  %v315_v22 = vpop.f32.mrb[5].mxu0  ;;  %v366_v23 = vpop.f32.mrb[5].mxu1  ;;  %v393_v24 = vmul.f32 0.70710677, %v1233_v20 }
 0x136   :  { %1056 = verf.f32 %v390_v18  ;;  %v392_v25 = vmul.f32 0.70710677, %v315_v22  ;;  %v317_v26 = vpop.f32.mrb[6].mxu0  ;;  %v394_v27 = vmul.f32 0.70710677, %v366_v23  ;;  %v368_v28 = vpop.f32.mrb[6].mxu1 }
 0x137   :  { %1058 = verf.f32 %v391_v21  ;;  %v318_v29 = vpop.f32.mrb[7].mxu0  ;;  %v369_v30 = vpop.f32.mrb[7].mxu1  ;;  %v380_v5 = vmul.f32 0.5, %v315_v22  ;;  %v382_v9 = vmul.f32 0.5, %v366_v23  ;;  %v379_v14 = vmul.f32 0.5, %v1231_v19 }
 0x138   :  { %1060 = verf.f32 %v393_v24  ;;  %v381_v16 = vmul.f32 0.5, %v1233_v20 }
 0x139   :  { %v1043_v31 = vpop.eup %1042  ;;  %1062 = verf.f32 %v392_v25 }
 0x13a   :  { %v1045_v32 = vpop.eup %1044  ;;  %1064 = verf.f32 %v394_v27  ;;  %v407_v35 = vadd.f32 1.0, %v1043_v31 }
 0x13b   :  { %v1047_v33 = vpop.eup %1046  ;;  %v409_v39 = vadd.f32 1.0, %v1045_v32 }
 0x13c   :  { %v1049_v34 = vpop.eup %1048  ;;  %v408_v42 = vadd.f32 1.0, %v1047_v33  ;;  %v419_v51 = vmul.f32 %v407_v35, %v371_v37 }
 0x13d   :  { %v1051_v36 = vpop.eup %1050  ;;  %v410_v47 = vadd.f32 1.0, %v1049_v34  ;;  %v421_v56 = vmul.f32 %v409_v39, %v373_v38 }
 0x13e   :  { %v1053_v40 = vpop.eup %1052  ;;  %v411_v44 = vadd.f32 1.0, %v1051_v36  ;;  %v420_v61 = vmul.f32 %v408_v42, %v372_v41 }
 0x13f   :  { %v1055_v45 = vpop.eup %1054  ;;  %v413_v49 = vadd.f32 1.0, %v1053_v40  ;;  %v422_v1 = vmul.f32 %v410_v47, %v374_v46 }
 0x140   :  { %v1057_v50 = vpop.eup %1056  ;;  %v423_v52 = vmul.f32 %v411_v44, %v375_v43  ;;  %v412_v54 = vadd.f32 1.0, %v1055_v45 }
 0x141   :  { %v1059_v55 = vpop.eup %1058  ;;  %v425_v57 = vmul.f32 %v413_v49, %v377_v48  ;;  %v414_v59 = vadd.f32 1.0, %v1057_v50 }
 0x142   :  { %v1061_v60 = vpop.eup %1060  ;;  %v434_v62 = vpack.c.bf16 %v423_v52, %v419_v51  ;;  %v424_v63 = vmul.f32 %v412_v54, %v376_v53  ;;  %v415_v8 = vadd.f32 1.0, %v1059_v55 }
 0x143   :  { %v1063_v0 = vpop.eup %1062  ;;  %v436_v2 = vpack.c.bf16 %v425_v57, %v421_v56  ;;  %v426_v3 = vmul.f32 %v414_v59, %v378_v58  ;;  %v417_v12 = vadd.f32 1.0, %v1061_v60 }
 0x144   :  { %v1065_v4 = vpop.eup %1064  ;;  %v416_v6 = vadd.f32 1.0, %v1063_v0  ;;  %v435_v7 = vpack.c.bf16 %v424_v63, %v420_v61  ;;  %v427_v18 = vmul.f32 %v415_v8, %v379_v14 }
 0x145   :  { %v418_v10 = vadd.f32 1.0, %v1065_v4  ;;  %v437_v11 = vpack.c.bf16 %v426_v3, %v422_v1  ;;  %v429_v22 = vmul.f32 %v417_v12, %v381_v16 }
 0x146   :  { %v428_v13 = vmul.f32 %v416_v6, %v380_v5  ;;  %730 = vmatprep.mubr.bf16.mxu0 %v435_v7  ;;  %v438_v23 = vpack.c.bf16 %v427_v18, %v427_v18 }
 0x147   :  { %v430_v15 = vmul.f32 %v418_v10, %v382_v9  ;;  %778 = vmatprep.mubr.bf16.mxu1 %v437_v11  ;;  %731 = vmatmul.mubr.bf16.vlgmr.msra.gmra.mrb[8].mxu0 %v434_v62  ;;  %v440_v24 = vpack.c.bf16 %v429_v22, %v429_v22 }
 0x148   :  { %779 = vmatmul.mubr.bf16.vlgmr.msra.gmra.mrb[8].mxu1 %v436_v2  ;;  %v439_v17 = vpack.c.bf16 %v428_v13, %v428_v13 }
 0x149   :  { %v441_v21 = vpack.c.bf16 %v430_v15, %v430_v15 }
 0x14a   :  { %738 = vmatprep.mubr.bf16.mxu0 %v439_v17 }
 0x14b   :  { %786 = vmatprep.mubr.bf16.mxu1 %v441_v21 }
 0x14f   :  { %739 = vmatmul.mubr.bf16.gmra.mrb[12].mxu0 %v438_v23 }
 0x150   :  { %787 = vmatmul.mubr.bf16.gmra.mrb[12].mxu1 %v440_v24 }
 0x21a   :  { %v909_v25 = vpop.f32.mrb[8].mxu0 }
 0x21b   :  { %v937_v26 = vpop.f32.mrb[8].mxu1  ;;  %v910_v27 = vpop.f32.mrb[9].mxu0 }
 0x21c   :  { %v911_v19 = vadd.f32 %v910_v27, %v909_v25  ;;  %v938_v28 = vpop.f32.mrb[9].mxu1  ;;  %v912_v29 = vpop.f32.mrb[10].mxu0 }
 0x21d   :  { %v939_v30 = vadd.f32 %v938_v28, %v937_v26  ;;  %v940_v31 = vpop.f32.mrb[10].mxu1  ;;  %v913_v20 = vpop.f32.mrb[11].mxu0 }
 0x21e   :  { %v914_v32 = vadd.f32 %v913_v20, %v912_v29  ;;  %v941_v33 = vpop.f32.mrb[11].mxu1 }
 0x21f   :  { %v781_v34 = vadd.f32 %v939_v30, %v911_v19  ;;  %v942_v35 = vadd.f32 %v941_v33, %v940_v31 }
 0x221   :  { %806 = vst [vmem:[#allocation9] sm:$0xff] %v781_v34  ;;  %v784_v36 = vadd.f32 %v942_v35, %v914_v32 }
 0x222   :  { %v915_v37 = vpop.f32.mrb[12].mxu0 }
 0x223   :  { %807 = vst [vmem:[#allocation9 + $0x8] sm:$0xff] %v784_v36  ;;  %v943_v38 = vpop.f32.mrb[12].mxu1  ;;  %v916_v39 = vpop.f32.mrb[13].mxu0 }
 0x224   :  { %v917_v40 = vadd.f32 %v916_v39, %v915_v37  ;;  %v944_v41 = vpop.f32.mrb[13].mxu1  ;;  %v918_v42 = vpop.f32.mrb[14].mxu0 }
 0x225   :  { %v945_v43 = vadd.f32 %v944_v41, %v943_v38  ;;  %v946_v44 = vpop.f32.mrb[14].mxu1  ;;  %v919_v45 = vpop.f32.mrb[15].mxu0 }
 0x226   :  { %v947_v46 = vpop.f32.mrb[15].mxu1 }
 0x227   :  { %v789_v47 = vadd.f32 %v945_v43, %v917_v40 }
 0x229   :  { %808 = vst [vmem:[#allocation9 + $0x10] sm:$0xff] %v789_v47 }
 0x22a   :  { %1143 = shalt.err (!%p1140_p0)
}
 0x22b   :  { %s1144_s27 = scalar_lea.hbm %s1254_s3, 384 }
 0x22c   :  { %p1145_p1 = scmp.ne.s32.totalorder %s1254_s3, %s1144_s27  ;;  %p1148_p2 = scmp.lt.u32.totalorder %s1144_s27, %s1254_s3 }
 0x22e   :  { %p1150_p3 = pnand %p1148_p2, %p1145_p1 }
 0x230   :  { %1153 = shalt.err (!%p1150_p3)
}
 0x231   :  { %s1169_s5 = smov 128   ;;  %s1170_s6 = smov 8  }
 0x232   :  { %820 = dma.vmem_to_hbm [thread:$0]  %s815_s23, 384, %s1254_s3, [#allocation5], %s1169_s5, %s1169_s5, %s1170_s6  }
 0x233   :  { %1158 = dma.done.wait [#allocation5], 384  }
 0x234   :  { %1159 = vsyncadd [#allocation5], 4294966912 }
 0x235   :  { %824 = vsyncpa [#allocation4], 1 }
 0x236   :  { %825 = vsyncpa [#allocation7], 1 }
 0x237   :  { %826 = vsyncpa [#allocation5], 1 }

</bundles_post_ra>
